<compile_context>
chip_gen: v6e
topology: v6e:2x2x1
jax: 0.10.0
libtpu: 0.0.40
codegen_flags: <defaults>
</compile_context>

<pallas_src>
import functools
import math

import jax
import jax.numpy as jnp
from jax.experimental import pallas as pl
from jax.experimental.pallas import tpu as pltpu


def _block_kernel(x_ref, wqkv_ref, wo_ref, w1_ref, w2_ref, o_ref, y16_ref, acc_ref,
                  *, num_heads: int, d_k: int, seq_len: int, bf16_pointwise: bool):
    N, D = x_ref.shape                 # N = batch_tile * seq_len rows, D = d_model
    S = seq_len
    bt = N // S
    f = pl.program_id(1)               # d_ff tile index ("arbitrary" reduction axis)

    # ----------------- attention + residual-1 (first d_ff step only) -----------------
    @pl.when(f == 0)
    def _attention():
        x = x_ref[...]                                       # (N, D) f32, kept for residual
        xb = x.astype(jnp.bfloat16)

        # Fused QKV projection: one bf16 MXU op, f32 accumulation (scale folded into Wq).
        qkv = jnp.dot(xb, wqkv_ref[...], preferred_element_type=jnp.float32)   # (N, 3D)
        q3 = qkv[:, 0 * D:1 * D].reshape(bt, S, D).astype(jnp.bfloat16)
        k3 = qkv[:, 1 * D:2 * D].reshape(bt, S, D).astype(jnp.bfloat16)
        v3 = qkv[:, 2 * D:3 * D].reshape(bt, S, D).astype(jnp.bfloat16)

        # Causal mask stays (S, S); jnp.where broadcasts it.  Diagonal never masked,
        # so -inf is NaN-safe here.
        row = jax.lax.broadcasted_iota(jnp.int32, (S, S), 0)
        col = jax.lax.broadcasted_iota(jnp.int32, (S, S), 1)
        causal = col > row

        dn_scores = (((2,), (2,)), ((0,), (0,)))   # (bt,S,dk) x (bt,S,dk) -> (bt,S,S)
        dn_attn = (((2,), (1,)), ((0,), (0,)))     # (bt,S,S)  x (bt,S,dk) -> (bt,S,dk)

        heads = []
        for h in range(num_heads):
            lo = h * d_k
            qh = q3[:, :, lo:lo + d_k]
            kh = k3[:, :, lo:lo + d_k]
            vh = v3[:, :, lo:lo + d_k]

            s = jax.lax.dot_general(qh, kh, dn_scores,
                                    preferred_element_type=jnp.float32)    # (bt,S,S) f32
            s = jnp.where(causal, -jnp.inf, s)

            # softmax (exact reference formulation); divide -> EUP approx reciprocal.
            m = jnp.max(s, axis=-1, keepdims=True)
            e = jnp.exp(s - m)
            r = pl.reciprocal(jnp.sum(e, axis=-1, keepdims=True), approx=True)
            if bf16_pointwise:                      # v6e/v7x bf16 VPU path
                p = e.astype(jnp.bfloat16) * r.astype(jnp.bfloat16)
            else:                                   # v5e: keep pointwise f32
                p = (e * r).astype(jnp.bfloat16)

            oh = jax.lax.dot_general(p, vh, dn_attn,
                                     preferred_element_type=jnp.float32)   # (bt,S,dk)
            heads.append(oh)

        # Head concat + ONE output projection (single contraction over (H, d_k)).
        attn_cat = jnp.concatenate(heads, axis=-1)                          # (bt,S,D) f32
        attn_cat = attn_cat.reshape(N, D).astype(jnp.bfloat16)
        attn = jnp.dot(attn_cat, wo_ref[...], preferred_element_type=jnp.float32)

        y = x + attn                                 # residual 1, f32
        y16_ref[...] = y.astype(jnp.bfloat16)        # FFN matmul operand
        acc_ref[...] = y                             # output accumulator starts at y

    # ----------------- FFN partial for this d_ff tile (every step) -----------------
    h1 = jnp.dot(y16_ref[...], w1_ref[...], preferred_element_type=jnp.float32)   # (N, tff)
    erf_t = jax.lax.erf(h1 * (1.0 / math.sqrt(2.0)))          # exact-erf GELU, erf input f32
    if bf16_pointwise:
        gate = 0.5 * (1.0 + erf_t.astype(jnp.bfloat16))       # bf16 pointwise chain
        g = h1.astype(jnp.bfloat16) * gate
    else:
        g = (h1 * (0.5 * (1.0 + erf_t))).astype(jnp.bfloat16)
    acc_ref[...] += jnp.dot(g, w2_ref[...], preferred_element_type=jnp.float32)   # (N, D)

    @pl.when(f == pl.num_programs(1) - 1)
    def _finalize():
        o_ref[...] = acc_ref[...].astype(o_ref.dtype)          # y + FFN(y)


def _auto_batch_tile(batch: int, seq: int, target_rows: int = 256) -> int:
    """Smallest divisor of `batch` whose row block reaches >= target_rows MXU rows,
    while keeping >= 2 grid steps so v7x's 2 TensorCores both get work."""
    max_bt = max(1, batch // 2)
    best = 1
    for bt in range(1, max_bt + 1):
        if batch % bt == 0:
            best = bt
            if bt * seq >= target_rows:
                break
    return best


def _auto_ff_tile(d_ff: int, target: int = 2048) -> int:
    """Largest multiple-of-128 divisor of d_ff that is <= target; small / non-tileable
    d_ff stays untiled (degenerates to a single d_ff grid step)."""
    if d_ff <= target or d_ff % 128 != 0:
        return d_ff
    for cand in range(target - target % 128, 127, -128):
        if d_ff % cand == 0:
            return cand
    return d_ff


def _default_bf16_pointwise() -> bool:
    # bf16 VPU/EUP path exists on v6e/v7x; keep f32 pointwise on v5e and older.
    try:
        kind = jax.devices()[0].device_kind.lower()
    except Exception:
        return False
    return ("v6" in kind) or ("v7" in kind)


def transformer_block_pallas(x, wq_t, wk_t, wv_t, wo_t, w1_t, w2_t, *,
                             num_heads: int, batch_tile=None, ff_tile=None,
                             bf16_pointwise=None):
    """x: (B, S, D) float32; all weights pre-transposed to (in, out), float32."""
    B, S, D = x.shape
    d_ff = w1_t.shape[1]
    d_k = D // num_heads
    assert num_heads * d_k == D, "d_model must be divisible by num_heads"

    bt = _auto_batch_tile(B, S) if batch_tile is None else batch_tile
    assert B % bt == 0, "batch must be divisible by batch_tile"
    assert bt == B or (bt * S) % 8 == 0, "row block must be a multiple of 8 sublanes"
    tff = _auto_ff_tile(d_ff) if ff_tile is None else ff_tile
    assert d_ff % tff == 0, "d_ff must be divisible by ff_tile"
    nf = d_ff // tff
    if bf16_pointwise is None:
        bf16_pointwise = _default_bf16_pointwise()

    # Fold 1/sqrt(d_k) into Wq, fuse Q|K|V into one (D, 3D) weight, pre-cast to bf16
    # (half the DMA / resident VMEM); matmuls accumulate in f32 inside the kernel.
    inv_sqrt_dk = 1.0 / math.sqrt(float(d_k))
    wqkv_b = jnp.concatenate([wq_t * inv_sqrt_dk, wk_t, wv_t], axis=1).astype(jnp.bfloat16)
    wo_b = wo_t.astype(jnp.bfloat16)
    w1_b = w1_t.astype(jnp.bfloat16)
    w2_b = w2_t.astype(jnp.bfloat16)

    x2 = x.reshape(B * S, D)          # free HBM reshape; kernel blocks are 2-D row slabs
    n_rows = bt * S

    kernel = functools.partial(_block_kernel, num_heads=num_heads, d_k=d_k,
                               seq_len=S, bf16_pointwise=bf16_pointwise)

    # Advisory cost estimate for the XLA scheduler.
    flops = (2 * B * S * D * 3 * D            # fused QKV projection
             + 4 * B * S * S * D              # scores + attn@V over all heads
             + 2 * B * S * D * D              # output projection
             + 4 * B * S * D * d_ff)          # FFN
    transcendentals = B * num_heads * S * S + B * S * d_ff
    bytes_accessed = 2 * 4 * B * S * D + 2 * (4 * D * D + 2 * D * d_ff)

    # VMEM budget sized to the actual buffers (invariant weights single-buffered, W1/W2
    # tiles and x/out blocks double-buffered, scratch + in-kernel temporaries headroom).
    w_resident = 2 * (3 * D * D + D * D)                 # bf16 Wqkv + Wo, single-buffered
    w_pipelined = 2 * 2 * 2 * D * tff                    # bf16 W1/W2 tiles, 2 buffers each
    io = 2 * 2 * n_rows * D * 4                          # x & out f32 blocks, 2 buffers
    scratch = n_rows * D * (2 + 4)                       # y16 (bf16) + acc (f32)
    temps = 4 * (3 * n_rows * D + bt * S * S + 2 * n_rows * tff)
    est = w_resident + w_pipelined + io + scratch + temps
    vmem_limit = int(min(112 * 1024 * 1024, max(32 * 1024 * 1024, 2 * est)))

    out = pl.pallas_call(
        kernel,
        out_shape=jax.ShapeDtypeStruct((B * S, D), x.dtype),
        grid_spec=pltpu.PrefetchScalarGridSpec(
            num_scalar_prefetch=0,
            grid=(B // bt, nf),                           # (batch-row tiles, d_ff tiles)
            in_specs=[
                pl.BlockSpec((n_rows, D), lambda b, f: (b, 0)),       # x row slab
                # Grid-invariant weights: whole-array VMEM residents (single-buffered).
                pl.BlockSpec(memory_space=pltpu.MemorySpace.VMEM),    # Wqkv (D, 3D) bf16
                pl.BlockSpec(memory_space=pltpu.MemorySpace.VMEM),    # Wo   (D, D)  bf16
                pl.BlockSpec((D, tff), lambda b, f: (0, f)),          # W1 tile (streamed)
                pl.BlockSpec((tff, D), lambda b, f: (f, 0)),          # W2 tile (streamed)
            ],
            out_specs=pl.BlockSpec((n_rows, D), lambda b, f: (b, 0)),
            scratch_shapes=[
                pltpu.VMEM((n_rows, D), jnp.bfloat16),    # y = x + attn (FFN operand)
                pltpu.VMEM((n_rows, D), jnp.float32),     # output accumulator
            ],
        ),
        compiler_params=pltpu.CompilerParams(
            dimension_semantics=("parallel", "arbitrary"),
            vmem_limit_bytes=vmem_limit),
        cost_estimate=pl.CostEstimate(flops=flops,
                                      transcendentals=transcendentals,
                                      bytes_accessed=bytes_accessed),
    )(x2, wqkv_b, wo_b, w1_b, w2_b)
    return out.reshape(B, S, D)


# ----------------------- pure-JAX reference (for verification) -----------------------
def _reference(x, wq_t, wk_t, wv_t, wo_t, w1_t, w2_t, num_heads):
    B, S, D = x.shape
    d_k = D // num_heads
    q = x @ wq_t
    k = x @ wk_t
    v = x @ wv_t

    def split_heads(t):
        return t.reshape(B, S, num_heads, d_k).transpose(0, 2, 1, 3)  # (B,H,S,dk)

    qh, kh, vh = split_heads(q), split_heads(k), split_heads(v)
    scores = jnp.einsum("bhqd,bhkd->bhqk", qh, kh) / math.sqrt(d_k)
    mask = jnp.triu(jnp.ones((S, S), dtype=bool), k=1)
    scores = jnp.where(mask, -jnp.inf, scores)
    m = jnp.max(scores, axis=-1, keepdims=True)
    e = jnp.exp(scores - m)
    w = e / jnp.sum(e, axis=-1, keepdims=True)
    attn = jnp.einsum("bhqk,bhkd->bhqd", w, vh)
    attn = attn.transpose(0, 2, 1, 3).reshape(B, S, D)
    y = x + attn @ wo_t
    h1 = y @ w1_t
    g = h1 * 0.5 * (1.0 + jax.lax.erf(h1 / math.sqrt(2.0)))
    return y + g @ w2_t


if __name__ == "__main__":
    # Small shapes consistent with the module: batch=2, seq=16, d_model=32, heads=4, d_ff=64.
    B, S, D, H, DFF = 2, 16, 32, 4, 64

    key = jax.random.PRNGKey(0)
    kx, kq, kk, kv, ko, k1, k2 = jax.random.split(key, 7)

    x = jax.random.normal(kx, (B, S, D), dtype=jnp.float32)

    # PyTorch nn.Linear stores W as (out, in); build (out, in) then pass .T = (in, out).
    scale = 0.02
    Wq = scale * jax.random.normal(kq, (D, D), dtype=jnp.float32)
    Wk = scale * jax.random.normal(kk, (D, D), dtype=jnp.float32)
    Wv = scale * jax.random.normal(kv, (D, D), dtype=jnp.float32)
    Wo = scale * jax.random.normal(ko, (D, D), dtype=jnp.float32)
    W1 = scale * jax.random.normal(k1, (DFF, D), dtype=jnp.float32)
    W2 = scale * jax.random.normal(k2, (D, DFF), dtype=jnp.float32)

    args = (x, Wq.T, Wk.T, Wv.T, Wo.T, W1.T, W2.T)

    # Auto batch_tile -> 1 (keeps 2 grid steps for v7x); d_ff=64 -> single d_ff tile.
    out = transformer_block_pallas(*args, num_heads=H)
    out = jax.block_until_ready(out)

    ref = _reference(*args, num_heads=H)
    assert out.shape == (B, S, D)
    err = float(jnp.max(jnp.abs(out - ref)))
    assert err < 5e-2, err

    print("KERNEL_OK")
</pallas_src>

<mosaic_0001>
module attributes {stable_mosaic.version = 11 : i64} {
  func.func @_block_kernel(%arg0: i32, %arg1: i32, %arg2: memref<16x32xf32, #tpu.memory_space<vmem>>, %arg3: memref<32x96xbf16, #tpu.memory_space<vmem>>, %arg4: memref<32x32xbf16, #tpu.memory_space<vmem>>, %arg5: memref<32x64xbf16, #tpu.memory_space<vmem>>, %arg6: memref<64x32xbf16, #tpu.memory_space<vmem>>, %arg7: memref<16x32xf32, #tpu.memory_space<vmem>>, %arg8: memref<16x32xbf16, #tpu.memory_space<vmem>>, %arg9: memref<16x32xf32, #tpu.memory_space<vmem>>) attributes {dimension_semantics = [#tpu.dimension_semantics<parallel>, #tpu.dimension_semantics<arbitrary>], iteration_bounds = array<i64: 2, 1>, scalar_prefetch = 0 : i64, scratch_operands = 2 : i64, tpu.core_type = #tpu.core_type<tc>, window_params = [{transform_indices = @transform_0, window_bounds = array<i64: 16, 32>}, {pipeline_mode = #tpu.pipeline_mode<synchronous>, transform_indices = @transform_1, window_bounds = array<i64: 32, 96>}, {pipeline_mode = #tpu.pipeline_mode<synchronous>, transform_indices = @transform_2, window_bounds = array<i64: 32, 32>}, {transform_indices = @transform_3, window_bounds = array<i64: 32, 64>}, {transform_indices = @transform_4, window_bounds = array<i64: 64, 32>}, {transform_indices = @transform_5, window_bounds = array<i64: 16, 32>}]} {
    %c0_i32 = arith.constant 0 : i32
    %0 = arith.cmpi eq, %arg1, %c0_i32 : i32
    %1 = arith.extui %0 : i1 to i32
    %c0_i32_0 = arith.constant 0 : i32
    %2 = arith.cmpi ne, %1, %c0_i32_0 : i32
    scf.if %2 {
      %c0_16 = arith.constant 0 : index
      %c0_17 = arith.constant 0 : index
      %23 = vector.load %arg2[%c0_16, %c0_17] : memref<16x32xf32, #tpu.memory_space<vmem>>, vector<16x32xf32>
      %24 = arith.truncf %23 : vector<16x32xf32> to vector<16x32xbf16>
      %c0_18 = arith.constant 0 : index
      %c0_19 = arith.constant 0 : index
      %25 = vector.load %arg3[%c0_18, %c0_19] : memref<32x96xbf16, #tpu.memory_space<vmem>>, vector<32x96xbf16>
      %cst_20 = arith.constant dense<0.000000e+00> : vector<16x96xf32>
      %26 = tpu.matmul %24, %25, %cst_20 {dimension_numbers = #tpu.dot_dimension_numbers<[1], [0], [0], [1], [0, 0, 1, 1], [], []>} : vector<16x32xbf16>, vector<32x96xbf16>, vector<16x96xf32> -> vector<16x96xf32>
      %27 = vector.extract_strided_slice %26 {offsets = [0, 0], sizes = [16, 32], strides = [1, 1]} : vector<16x96xf32> to vector<16x32xf32>
      %28 = vector.shape_cast %27 : vector<16x32xf32> to vector<1x16x32xf32>
      %29 = arith.truncf %28 : vector<1x16x32xf32> to vector<1x16x32xbf16>
      %30 = vector.extract_strided_slice %26 {offsets = [0, 32], sizes = [16, 32], strides = [1, 1]} : vector<16x96xf32> to vector<16x32xf32>
      %31 = vector.shape_cast %30 : vector<16x32xf32> to vector<1x16x32xf32>
      %32 = arith.truncf %31 : vector<1x16x32xf32> to vector<1x16x32xbf16>
      %33 = vector.extract_strided_slice %26 {offsets = [0, 64], sizes = [16, 32], strides = [1, 1]} : vector<16x96xf32> to vector<16x32xf32>
      %34 = vector.shape_cast %33 : vector<16x32xf32> to vector<1x16x32xf32>
      %35 = arith.truncf %34 : vector<1x16x32xf32> to vector<1x16x32xbf16>
      %36 = tpu.iota {dimensions = array<i32: 0>} : vector<16x16xi32>
      %37 = tpu.iota {dimensions = array<i32: 1>} : vector<16x16xi32>
      %38 = arith.cmpi sgt, %37, %36 : vector<16x16xi32>
      %39 = vector.extract_strided_slice %29 {offsets = [0, 0, 0], sizes = [1, 16, 8], strides = [1, 1, 1]} : vector<1x16x32xbf16> to vector<1x16x8xbf16>
      %40 = vector.extract_strided_slice %32 {offsets = [0, 0, 0], sizes = [1, 16, 8], strides = [1, 1, 1]} : vector<1x16x32xbf16> to vector<1x16x8xbf16>
      %41 = vector.extract_strided_slice %35 {offsets = [0, 0, 0], sizes = [1, 16, 8], strides = [1, 1, 1]} : vector<1x16x32xbf16> to vector<1x16x8xbf16>
      %cst_21 = arith.constant dense<0.000000e+00> : vector<1x16x16xf32>
      %42 = tpu.matmul %39, %40, %cst_21 {dimension_numbers = #tpu.dot_dimension_numbers<[2], [2], [1], [1], [0, 0, 0, 1, 1, 1], [0], [0]>} : vector<1x16x8xbf16>, vector<1x16x8xbf16>, vector<1x16x16xf32> -> vector<1x16x16xf32>
      %cst_22 = arith.constant 0xFF800000 : f32
      %43 = vector.shape_cast %38 : vector<16x16xi1> to vector<1x16x16xi1>
      %44 = vector.broadcast %cst_22 : f32 to vector<1x16x16xf32>
      %45 = arith.select %43, %44, %42 : vector<1x16x16xi1>, vector<1x16x16xf32>
      %cst_23 = arith.constant dense<0xFF800000> : vector<1x16xf32>
      %46 = vector.multi_reduction <maximumf>, %45, %cst_23 [2] : vector<1x16x16xf32> to vector<1x16xf32>
      %47 = vector.shape_cast %46 : vector<1x16xf32> to vector<1x16x1xf32>
      %48 = vector.broadcast %47 : vector<1x16x1xf32> to vector<1x16x16xf32>
      %49 = arith.subf %45, %48 : vector<1x16x16xf32>
      %50 = math.exp %49 : vector<1x16x16xf32>
      %cst_24 = arith.constant dense<0.000000e+00> : vector<1x16xf32>
      %51 = vector.multi_reduction <add>, %50, %cst_24 [2] : vector<1x16x16xf32> to vector<1x16xf32>
      %52 = vector.shape_cast %51 : vector<1x16xf32> to vector<1x16x1xf32>
      %53 = tpu.reciprocal %52 {approx = true} : vector<1x16x1xf32> -> vector<1x16x1xf32>
      %54 = vector.broadcast %53 : vector<1x16x1xf32> to vector<1x16x16xf32>
      %55 = arith.mulf %50, %54 : vector<1x16x16xf32>
      %56 = arith.truncf %55 : vector<1x16x16xf32> to vector<1x16x16xbf16>
      %cst_25 = arith.constant dense<0.000000e+00> : vector<1x16x8xf32>
      %57 = tpu.matmul %56, %41, %cst_25 {dimension_numbers = #tpu.dot_dimension_numbers<[2], [1], [1], [2], [0, 0, 0, 1, 1, 2], [0], [0]>} : vector<1x16x16xbf16>, vector<1x16x8xbf16>, vector<1x16x8xf32> -> vector<1x16x8xf32>
      %58 = vector.extract_strided_slice %29 {offsets = [0, 0, 8], sizes = [1, 16, 8], strides = [1, 1, 1]} : vector<1x16x32xbf16> to vector<1x16x8xbf16>
      %59 = vector.extract_strided_slice %32 {offsets = [0, 0, 8], sizes = [1, 16, 8], strides = [1, 1, 1]} : vector<1x16x32xbf16> to vector<1x16x8xbf16>
      %60 = vector.extract_strided_slice %35 {offsets = [0, 0, 8], sizes = [1, 16, 8], strides = [1, 1, 1]} : vector<1x16x32xbf16> to vector<1x16x8xbf16>
      %cst_26 = arith.constant dense<0.000000e+00> : vector<1x16x16xf32>
      %61 = tpu.matmul %58, %59, %cst_26 {dimension_numbers = #tpu.dot_dimension_numbers<[2], [2], [1], [1], [0, 0, 0, 1, 1, 1], [0], [0]>} : vector<1x16x8xbf16>, vector<1x16x8xbf16>, vector<1x16x16xf32> -> vector<1x16x16xf32>
      %cst_27 = arith.constant 0xFF800000 : f32
      %62 = vector.shape_cast %38 : vector<16x16xi1> to vector<1x16x16xi1>
      %63 = vector.broadcast %cst_27 : f32 to vector<1x16x16xf32>
      %64 = arith.select %62, %63, %61 : vector<1x16x16xi1>, vector<1x16x16xf32>
      %cst_28 = arith.constant dense<0xFF800000> : vector<1x16xf32>
      %65 = vector.multi_reduction <maximumf>, %64, %cst_28 [2] : vector<1x16x16xf32> to vector<1x16xf32>
      %66 = vector.shape_cast %65 : vector<1x16xf32> to vector<1x16x1xf32>
      %67 = vector.broadcast %66 : vector<1x16x1xf32> to vector<1x16x16xf32>
      %68 = arith.subf %64, %67 : vector<1x16x16xf32>
      %69 = math.exp %68 : vector<1x16x16xf32>
      %cst_29 = arith.constant dense<0.000000e+00> : vector<1x16xf32>
      %70 = vector.multi_reduction <add>, %69, %cst_29 [2] : vector<1x16x16xf32> to vector<1x16xf32>
      %71 = vector.shape_cast %70 : vector<1x16xf32> to vector<1x16x1xf32>
      %72 = tpu.reciprocal %71 {approx = true} : vector<1x16x1xf32> -> vector<1x16x1xf32>
      %73 = vector.broadcast %72 : vector<1x16x1xf32> to vector<1x16x16xf32>
      %74 = arith.mulf %69, %73 : vector<1x16x16xf32>
      %75 = arith.truncf %74 : vector<1x16x16xf32> to vector<1x16x16xbf16>
      %cst_30 = arith.constant dense<0.000000e+00> : vector<1x16x8xf32>
      %76 = tpu.matmul %75, %60, %cst_30 {dimension_numbers = #tpu.dot_dimension_numbers<[2], [1], [1], [2], [0, 0, 0, 1, 1, 2], [0], [0]>} : vector<1x16x16xbf16>, vector<1x16x8xbf16>, vector<1x16x8xf32> -> vector<1x16x8xf32>
      %77 = vector.extract_strided_slice %29 {offsets = [0, 0, 16], sizes = [1, 16, 8], strides = [1, 1, 1]} : vector<1x16x32xbf16> to vector<1x16x8xbf16>
      %78 = vector.extract_strided_slice %32 {offsets = [0, 0, 16], sizes = [1, 16, 8], strides = [1, 1, 1]} : vector<1x16x32xbf16> to vector<1x16x8xbf16>
      %79 = vector.extract_strided_slice %35 {offsets = [0, 0, 16], sizes = [1, 16, 8], strides = [1, 1, 1]} : vector<1x16x32xbf16> to vector<1x16x8xbf16>
      %cst_31 = arith.constant dense<0.000000e+00> : vector<1x16x16xf32>
      %80 = tpu.matmul %77, %78, %cst_31 {dimension_numbers = #tpu.dot_dimension_numbers<[2], [2], [1], [1], [0, 0, 0, 1, 1, 1], [0], [0]>} : vector<1x16x8xbf16>, vector<1x16x8xbf16>, vector<1x16x16xf32> -> vector<1x16x16xf32>
      %cst_32 = arith.constant 0xFF800000 : f32
      %81 = vector.shape_cast %38 : vector<16x16xi1> to vector<1x16x16xi1>
      %82 = vector.broadcast %cst_32 : f32 to vector<1x16x16xf32>
      %83 = arith.select %81, %82, %80 : vector<1x16x16xi1>, vector<1x16x16xf32>
      %cst_33 = arith.constant dense<0xFF800000> : vector<1x16xf32>
      %84 = vector.multi_reduction <maximumf>, %83, %cst_33 [2] : vector<1x16x16xf32> to vector<1x16xf32>
      %85 = vector.shape_cast %84 : vector<1x16xf32> to vector<1x16x1xf32>
      %86 = vector.broadcast %85 : vector<1x16x1xf32> to vector<1x16x16xf32>
      %87 = arith.subf %83, %86 : vector<1x16x16xf32>
      %88 = math.exp %87 : vector<1x16x16xf32>
      %cst_34 = arith.constant dense<0.000000e+00> : vector<1x16xf32>
      %89 = vector.multi_reduction <add>, %88, %cst_34 [2] : vector<1x16x16xf32> to vector<1x16xf32>
      %90 = vector.shape_cast %89 : vector<1x16xf32> to vector<1x16x1xf32>
      %91 = tpu.reciprocal %90 {approx = true} : vector<1x16x1xf32> -> vector<1x16x1xf32>
      %92 = vector.broadcast %91 : vector<1x16x1xf32> to vector<1x16x16xf32>
      %93 = arith.mulf %88, %92 : vector<1x16x16xf32>
      %94 = arith.truncf %93 : vector<1x16x16xf32> to vector<1x16x16xbf16>
      %cst_35 = arith.constant dense<0.000000e+00> : vector<1x16x8xf32>
      %95 = tpu.matmul %94, %79, %cst_35 {dimension_numbers = #tpu.dot_dimension_numbers<[2], [1], [1], [2], [0, 0, 0, 1, 1, 2], [0], [0]>} : vector<1x16x16xbf16>, vector<1x16x8xbf16>, vector<1x16x8xf32> -> vector<1x16x8xf32>
      %96 = vector.extract_strided_slice %29 {offsets = [0, 0, 24], sizes = [1, 16, 8], strides = [1, 1, 1]} : vector<1x16x32xbf16> to vector<1x16x8xbf16>
      %97 = vector.extract_strided_slice %32 {offsets = [0, 0, 24], sizes = [1, 16, 8], strides = [1, 1, 1]} : vector<1x16x32xbf16> to vector<1x16x8xbf16>
      %98 = vector.extract_strided_slice %35 {offsets = [0, 0, 24], sizes = [1, 16, 8], strides = [1, 1, 1]} : vector<1x16x32xbf16> to vector<1x16x8xbf16>
      %cst_36 = arith.constant dense<0.000000e+00> : vector<1x16x16xf32>
      %99 = tpu.matmul %96, %97, %cst_36 {dimension_numbers = #tpu.dot_dimension_numbers<[2], [2], [1], [1], [0, 0, 0, 1, 1, 1], [0], [0]>} : vector<1x16x8xbf16>, vector<1x16x8xbf16>, vector<1x16x16xf32> -> vector<1x16x16xf32>
      %cst_37 = arith.constant 0xFF800000 : f32
      %100 = vector.shape_cast %38 : vector<16x16xi1> to vector<1x16x16xi1>
      %101 = vector.broadcast %cst_37 : f32 to vector<1x16x16xf32>
      %102 = arith.select %100, %101, %99 : vector<1x16x16xi1>, vector<1x16x16xf32>
      %cst_38 = arith.constant dense<0xFF800000> : vector<1x16xf32>
      %103 = vector.multi_reduction <maximumf>, %102, %cst_38 [2] : vector<1x16x16xf32> to vector<1x16xf32>
      %104 = vector.shape_cast %103 : vector<1x16xf32> to vector<1x16x1xf32>
      %105 = vector.broadcast %104 : vector<1x16x1xf32> to vector<1x16x16xf32>
      %106 = arith.subf %102, %105 : vector<1x16x16xf32>
      %107 = math.exp %106 : vector<1x16x16xf32>
      %cst_39 = arith.constant dense<0.000000e+00> : vector<1x16xf32>
      %108 = vector.multi_reduction <add>, %107, %cst_39 [2] : vector<1x16x16xf32> to vector<1x16xf32>
      %109 = vector.shape_cast %108 : vector<1x16xf32> to vector<1x16x1xf32>
      %110 = tpu.reciprocal %109 {approx = true} : vector<1x16x1xf32> -> vector<1x16x1xf32>
      %111 = vector.broadcast %110 : vector<1x16x1xf32> to vector<1x16x16xf32>
      %112 = arith.mulf %107, %111 : vector<1x16x16xf32>
      %113 = arith.truncf %112 : vector<1x16x16xf32> to vector<1x16x16xbf16>
      %cst_40 = arith.constant dense<0.000000e+00> : vector<1x16x8xf32>
      %114 = tpu.matmul %113, %98, %cst_40 {dimension_numbers = #tpu.dot_dimension_numbers<[2], [1], [1], [2], [0, 0, 0, 1, 1, 2], [0], [0]>} : vector<1x16x16xbf16>, vector<1x16x8xbf16>, vector<1x16x8xf32> -> vector<1x16x8xf32>
      %115 = tpu.concatenate %57, %76, %95, %114 in 2 : vector<1x16x8xf32>, vector<1x16x8xf32>, vector<1x16x8xf32>, vector<1x16x8xf32> -> vector<1x16x32xf32>
      %116 = vector.shape_cast %115 : vector<1x16x32xf32> to vector<16x32xf32>
      %117 = arith.truncf %116 : vector<16x32xf32> to vector<16x32xbf16>
      %c0_41 = arith.constant 0 : index
      %c0_42 = arith.constant 0 : index
      %118 = vector.load %arg4[%c0_41, %c0_42] : memref<32x32xbf16, #tpu.memory_space<vmem>>, vector<32x32xbf16>
      %cst_43 = arith.constant dense<0.000000e+00> : vector<16x32xf32>
      %119 = tpu.matmul %117, %118, %cst_43 {dimension_numbers = #tpu.dot_dimension_numbers<[1], [0], [0], [1], [0, 0, 1, 1], [], []>} : vector<16x32xbf16>, vector<32x32xbf16>, vector<16x32xf32> -> vector<16x32xf32>
      %120 = arith.addf %23, %119 : vector<16x32xf32>
      %121 = arith.truncf %120 : vector<16x32xf32> to vector<16x32xbf16>
      %c0_44 = arith.constant 0 : index
      %c0_45 = arith.constant 0 : index
      %122 = vector.load %arg8[%c0_44, %c0_45] : memref<16x32xbf16, #tpu.memory_space<vmem>>, vector<16x32xbf16>
      tpu.vector_store %arg8[%c0_44, %c0_45], %121 {strides = array<i32>} : memref<16x32xbf16, #tpu.memory_space<vmem>>, vector<16x32xbf16>,
      %c0_46 = arith.constant 0 : index
      %c0_47 = arith.constant 0 : index
      %123 = vector.load %arg9[%c0_46, %c0_47] : memref<16x32xf32, #tpu.memory_space<vmem>>, vector<16x32xf32>
      tpu.vector_store %arg9[%c0_46, %c0_47], %120 {strides = array<i32>} : memref<16x32xf32, #tpu.memory_space<vmem>>, vector<16x32xf32>,
    } else {
    }
    %c0 = arith.constant 0 : index
    %c0_1 = arith.constant 0 : index
    %3 = vector.load %arg8[%c0, %c0_1] : memref<16x32xbf16, #tpu.memory_space<vmem>>, vector<16x32xbf16>
    %c0_2 = arith.constant 0 : index
    %c0_3 = arith.constant 0 : index
    %4 = vector.load %arg5[%c0_2, %c0_3] : memref<32x64xbf16, #tpu.memory_space<vmem>>, vector<32x64xbf16>
    %cst = arith.constant dense<0.000000e+00> : vector<16x64xf32>
    %5 = tpu.matmul %3, %4, %cst {dimension_numbers = #tpu.dot_dimension_numbers<[1], [0], [0], [1], [0, 0, 1, 1], [], []>} : vector<16x32xbf16>, vector<32x64xbf16>, vector<16x64xf32> -> vector<16x64xf32>
    %cst_4 = arith.constant 0.707106769 : f32
    %6 = vector.broadcast %cst_4 : f32 to vector<16x64xf32>
    %7 = arith.mulf %5, %6 : vector<16x64xf32>
    %8 = math.erf %7 : vector<16x64xf32>
    %cst_5 = arith.constant 1.000000e+00 : f32
    %9 = vector.broadcast %cst_5 : f32 to vector<16x64xf32>
    %10 = arith.addf %9, %8 : vector<16x64xf32>
    %cst_6 = arith.constant 5.000000e-01 : f32
    %11 = vector.broadcast %cst_6 : f32 to vector<16x64xf32>
    %12 = arith.mulf %11, %10 : vector<16x64xf32>
    %13 = arith.mulf %5, %12 : vector<16x64xf32>
    %14 = arith.truncf %13 : vector<16x64xf32> to vector<16x64xbf16>
    %c0_7 = arith.constant 0 : index
    %c0_8 = arith.constant 0 : index
    %15 = vector.load %arg9[%c0_7, %c0_8] : memref<16x32xf32, #tpu.memory_space<vmem>>, vector<16x32xf32>
    %c0_9 = arith.constant 0 : index
    %c0_10 = arith.constant 0 : index
    %16 = vector.load %arg6[%c0_9, %c0_10] : memref<64x32xbf16, #tpu.memory_space<vmem>>, vector<64x32xbf16>
    %cst_11 = arith.constant dense<0.000000e+00> : vector<16x32xf32>
    %17 = tpu.matmul %14, %16, %cst_11 {dimension_numbers = #tpu.dot_dimension_numbers<[1], [0], [0], [1], [0, 0, 1, 1], [], []>} : vector<16x64xbf16>, vector<64x32xbf16>, vector<16x32xf32> -> vector<16x32xf32>
    %18 = arith.addf %15, %17 : vector<16x32xf32>
    %c0_12 = arith.constant 0 : index
    %c0_13 = arith.constant 0 : index
    %19 = vector.load %arg9[%c0_12, %c0_13] : memref<16x32xf32, #tpu.memory_space<vmem>>, vector<16x32xf32>
    tpu.vector_store %arg9[%c0_12, %c0_13], %18 {strides = array<i32>} : memref<16x32xf32, #tpu.memory_space<vmem>>, vector<16x32xf32>,
    %c0_i32_14 = arith.constant 0 : i32
    %20 = arith.cmpi eq, %arg1, %c0_i32_14 : i32
    %21 = arith.extui %20 : i1 to i32
    %c0_i32_15 = arith.constant 0 : i32
    %22 = arith.cmpi ne, %21, %c0_i32_15 : i32
    scf.if %22 {
      %c0_16 = arith.constant 0 : index
      %c0_17 = arith.constant 0 : index
      %23 = vector.load %arg9[%c0_16, %c0_17] : memref<16x32xf32, #tpu.memory_space<vmem>>, vector<16x32xf32>
      %c0_18 = arith.constant 0 : index
      %c0_19 = arith.constant 0 : index
      %24 = vector.load %arg7[%c0_18, %c0_19] : memref<16x32xf32, #tpu.memory_space<vmem>>, vector<16x32xf32>
      tpu.vector_store %arg7[%c0_18, %c0_19], %23 {strides = array<i32>} : memref<16x32xf32, #tpu.memory_space<vmem>>, vector<16x32xf32>,
    } else {
    }
    return
  }
  func.func @transform_0(%arg0: i32, %arg1: i32) -> (i32, i32) {
    %c0_i32 = arith.constant 0 : i32
    %c0_i32_0 = arith.constant 0 : i32
    return %arg0, %c0_i32 : i32, i32
  }
  func.func @transform_1(%arg0: i32, %arg1: i32) -> (i32, i32) {
    %c0_i32 = arith.constant 0 : i32
    %c0_i32_0 = arith.constant 0 : i32
    %c0_i32_1 = arith.constant 0 : i32
    return %c0_i32, %c0_i32_0 : i32, i32
  }
  func.func @transform_2(%arg0: i32, %arg1: i32) -> (i32, i32) {
    %c0_i32 = arith.constant 0 : i32
    %c0_i32_0 = arith.constant 0 : i32
    %c0_i32_1 = arith.constant 0 : i32
    return %c0_i32, %c0_i32_0 : i32, i32
  }
  func.func @transform_3(%arg0: i32, %arg1: i32) -> (i32, i32) {
    %c0_i32 = arith.constant 0 : i32
    %c0_i32_0 = arith.constant 0 : i32
    return %c0_i32, %arg1 : i32, i32
  }
  func.func @transform_4(%arg0: i32, %arg1: i32) -> (i32, i32) {
    %c0_i32 = arith.constant 0 : i32
    %c0_i32_0 = arith.constant 0 : i32
    return %arg1, %c0_i32 : i32, i32
  }
  func.func @transform_5(%arg0: i32, %arg1: i32) -> (i32, i32) {
    %c0_i32 = arith.constant 0 : i32
    %c0_i32_0 = arith.constant 0 : i32
    return %arg0, %c0_i32 : i32, i32
  }
}

</mosaic_0001>

<bundles_post_ra>
// kernel: tpu_custom_call.1
= control target key start
LH: loop header
LB: loop body
LE: loop exit
PB: predicated region body
PF: predicated region fallthrough
CT: control target
= control target key end

     0   :  { %10 = vsyncpa [#allocation5], 0  ;;  %s2071_s0 = inlined_call_operand.vmem [shape: f32[32,32], index: 0, kind: input, shape index: {}]   ;;  %s2072_s1 = inlined_call_operand.vmem [shape: bf16[32,96], index: 1, kind: input, shape index: {}]   ;;  %s2073_s2 = inlined_call_operand.hbm [shape: bf16[32,32], index: 2, kind: input, shape index: {}]   ;;  %s2074_s3 = inlined_call_operand.hbm [shape: bf16[32,64], index: 3, kind: input, shape index: {}]   ;;  %s2075_s4 = inlined_call_operand.vmem [shape: bf16[64,32], index: 4, kind: input, shape index: {}]   ;;  %s2076_s5 = inlined_call_operand.hbm [shape: f32[32,32], index: 5, kind: output, shape index: {}]  }
   0x1   :  { %11 = vsyncpa [#allocation8], 0 }
   0x2   :  { %12 = vsyncpa [#allocation6], 0 }
   0x3   :  { %14 = vsyncpa [#allocation6 + $0x1], 0  ;;  %s1773_s18 = smov 0   ;;  %s1775_s19 = smov 0  }
   0x4   :  { %s1777_s20 = smov 0   ;;  %s1779_s21 = smov 0  }
   0x5   :  { %s1781_s22 = smov 0   ;;  %s1783_s23 = smov 0  }
   0x6 LB: > { %s1266_s24 = sadd.s32 4294967295, %s1719_s23   ;;  %s1267_s25 = sadd.s32 4294967294, %s1719_s23   ;;  %s1719_s23 = sphi %s1783_s23, %s20_s23   ;;  %s1715_s22 = sphi %s1781_s22, %s2089_s22   ;;  %s1711_s21 = sphi %s1779_s21, %s2088_s21   ;;  %s1707_s20 = sphi %s1777_s20, %s2087_s20   ;;  %s1703_s19 = sphi %s1775_s19, %s2086_s19   ;;  %s1699_s18 = sphi %s1773_s18, %s2085_s18  }
   0x7   : > { %s32_s26 = sadd.s32 1, %s1715_s22  ;;  %s159_s27 = sadd.s32 1, %s1707_s20 }
   0x8   : > { %p34_p0 = scmp.ge.s32.totalorder %s32_s26, 2  ;;  %p169_p1 = scmp.ne.s32.totalorder %s1707_s20, %s1703_s19 }
   0x9   : > { %p170_p2 = scmp.eq.s32.totalorder %s1266_s24, 1  ;;  %p175_p3 = scmp.ne.s32.totalorder %s1703_s19, %s1699_s18 }
   0xa   : > { %s2091_s26 = smov (%p34_p0, %s32_s26), 0  ;;  %p176_p5 = scmp.eq.s32.totalorder %s1267_s25, 1 }
   0xb   : > { %p1813_p4 = por %p170_p2, %p169_p1  ;;  %s156_s29 = ssub.s32 %s1715_s22, %s2091_s26 }
   0xc   : > { %p1268_p6 = scmp.ge.s32.totalorder %s1719_s23, 1  ;;  %p157_p7 = scmp.eq.s32.totalorder %s156_s29, 0 }
   0xd   : > { %s2078_s28 = scalar_select %p1813_p4, 1, 0 }
   0xe   : > { %p1820_p8 = por %p176_p5, %p175_p3  ;;  %p183_p9 = scmp.lt.s32.totalorder %s1719_s23, 3 }
   0xf   : > { %s1826_s6 = scalar_select %p157_p7, %s1707_s20, %s159_s27  }
  0x10   : > { %s2079_s30 = scalar_select %p1820_p8, 1, 0 }
  0x11   : > { %p1828_p10 = pnand %p1268_p6, %p183_p9  ;;  %p1832_p11 = scmp.eq.s32.totalorder %s1266_s24, 0 }
  0x12   : > { %s1721_s9 = smov [#allocation4]   ;;  %s1722_s12 = smov [#allocation7]  }
  0x13   : > { %p1436_p12 = pneg %p1828_p10  ;;  %s198_s10 = sshll.u32 %s1721_s9, 4  ;;  %s199_s10 = int_to_ptr.vmem [resolvable:$true] %s198_s10 }
  0x14   : > { %s213_s13 = sshll.u32 %s1722_s12, 4  ;;  %s1594_s14 = scalar_lea.vmem %s199_s10, 256  ;;  %s214_s13 = int_to_ptr.vmem [resolvable:$true] %s213_s13 }
  0x15   : > { %p1840_p13 = pnand %p1832_p11, %p1436_p12  ;;  %p1595_p1 = scmp.ne.s32.totalorder %s199_s10, %s1594_s14 }
  0x16   : > { %p1602_p5 = scmp.lt.s32.totalorder %s199_s10, %s199_s10  ;;  %p1603_p6 = scmp.lt.s32.totalorder %s1594_s14, %s1594_s14 }
  0x17   : > { %p1585_p0 = pneg %p1840_p13 }
  0x18   : > { %p1604_p7 = por %p1603_p6, %p1602_p5 }
  0x19   : > { %p1597_p2 = pnand %p1595_p1, %p1585_p0 }
  0x1b   : > { %p1598_p3 = pneg %p1597_p2 }
  0x1d   : > { %p1605_p9 = pnand %p1604_p7, %p1598_p3 }
  0x1f   : > { %1608 = shalt.err (!%p1605_p9)
}
  0x20   : > { %s1723_s15 = smov 64   ;;  %s1724_s16 = smov 4  }
  0x21   : > { %1439 = dma.hbm_to_vmem [thread:$0]  (!%p1840_p13), %s2073_s2, 256, %s199_s10, [#allocation5], %s1723_s15, %s1723_s15, %s1724_s16  }
  0x22   : > { %s1620_s25 = scalar_lea.vmem %s214_s13, 256  ;;  %p1628_p8 = scmp.lt.s32.totalorder %s214_s13, %s214_s13 }
  0x23   : > { %p1621_p12 = scmp.ne.s32.totalorder %s214_s13, %s1620_s25  ;;  %p1629_p4 = scmp.lt.s32.totalorder %s1620_s25, %s1620_s25 }
  0x25   : > { %p1623_p1 = pnand %p1621_p12, %p1585_p0  ;;  %p1630_p5 = por %p1629_p4, %p1628_p8 }
  0x27   : > { %p1624_p2 = pneg %p1623_p1 }
  0x29   : > { %p1631_p3 = pnand %p1630_p5, %p1624_p2 }
  0x2b   : > { %1634 = shalt.err (!%p1631_p3)
}
  0x2c   : > { %1442 = dma.hbm_to_vmem [thread:$0]  (!%p1840_p13), %s2074_s3, 256, %s214_s13, [#allocation8], %s1723_s15, %s1723_s15, %s1724_s16  }
  0x2d   : > { %247 = sbr.rel (%p1828_p10) target bundleno = 1936 (0x790), region = 40 }
  0x32   : > { %1686 = dma.done.wait (%p1832_p11), [#allocation5], 256  }
  0x33   : > { %1688 = vsyncadd (%p1832_p11), [#allocation5], 4294967040 }
  0x34   : > { %1690 = dma.done.wait (%p1832_p11), [#allocation8], 256  }
  0x35   : > { %1692 = vsyncadd (%p1832_p11), [#allocation8], 4294967040  ;;  %s1277_s9 = sshll.u32 %s1711_s21, 1  ;;  %v1725_v0 = vmov 0.0   ;;  %vm1726_vm0 = vmmov 0   ;;  %v1536_v1 = vld [vmem:[%s2072_s1 + $0x8] sm:$0xff]   ;;  %v367_v22 = vlaneseq }
  0x36   : > { %1342 = vmatprep.subr.bf16.mxu0 %v1725_v0  ;;  %1346 = vmatprep.mubr.msk.bf16.mxu0 %vm1726_vm0, %v1725_v0  ;;  %p285_p4 = scmp.lt.s32.totalorder %s1277_s9, 3  ;;  %v1537_v2 = vld [vmem:[%s2072_s1] sm:$0xff]   ;;  %vm321_vm1 = vcmask 261120   ;;  %s1727_s16 = smov 120   ;;  %vm377_vm2 = vcmask 64512   ;;  %vm427_vm4 = vcmask 130048  }
  0x37   : > { %1350 = vmatprep.subr.bf16.mxu1 %v1725_v0  ;;  %1352 = vmatprep.mubr.msk.bf16.mxu1 %vm1726_vm0, %v1725_v0  ;;  %s1728_s17 = smov 96   ;;  %s1729_s24 = smov 80   ;;  %v368_v23 = vshrl.u32 %v367_v22, 7  ;;  %v371_v24 = vand.u32 127, %v367_v22  ;;  %vm895_vm6 = vcmask 195584   ;;  %vm969_vm7 = vcmask 257024  }
  0x38   : > { %s2093_s9 = smov (!%p285_p4, %s1277_s9), 3  ;;  %1343 = vmatpush3.bf16.msra.mxu0 %v1536_v1  ;;  %s1730_s25 = smov 88   ;;  %vm1087_vm8 = vcmask 523264  }
  0x39   : > { %s1278_s7 = sshll.u32 %s2093_s9, 3  ;;  %1344 = vmatprep.subr.bf16.mxu0 %v1725_v0  ;;  %s1731_s27 = smov 72   ;;  %vm372_vm3 = vcmp.gt.s32.totalorder %v371_v24, %v368_v23  ;;  %v369_v25 = vadd.s32 8, %v368_v23 }
  0x3a   : > { %s288_s11 = scalar_lea.vmem %s2071_s0, %s1278_s7  ;;  %s1732_s29 = smov 112  }
  0x3b   : > { %v1888_v3 = vld [vmem:[%s288_s11] sm:$0xff]  ;;  %v1890_v4 = vld [vmem:[%s288_s11 + $0x8] sm:$0xff]  ;;  %s1733_s9 = smov 104   ;;  %vm373_vm5 = vcmp.gt.s32.totalorder %v371_v24, %v369_v25  ;;  %s1734_s7 = smov 56  }
  0x3c   : > { %v304_v5 = vpack.c.bf16 %v1890_v4, %v1888_v3  ;;  %1345 = vmatpush3.bf16.msra.mxu0 %v1537_v2  ;;  %s1735_s10 = smov 64   ;;  %s1736_s8 = smov 48  }
  0x3d   : > { %1356 = vmatprep.subr.bf16.mxu0 %v1725_v0  ;;  %s1737_s11 = smov 40   ;;  %s1738_s12 = smov 8  }
  0x3e   : > { %s1739_s13 = smov 16   ;;  %s1740_s14 = smov 24  }
  0x3f   : > { %1347 = vmatmul.mubr.msk.bf16.vlgmr.msra.gmra.mxu0 %vm321_vm1, %v304_v5  ;;  %p2083_p10 = scmp.ne.s32.totalorder %s2078_s28, 0 }
  0x40   : > { %1358 = vmatprep.mubr.msk.bf16.mxu0 %vm1726_vm0, %v1725_v0 }
  0xff   : > { %v359_v6 = vpop.f32.mrf.mxu0 }
 0x101   : > { %v1348_v7 = vpop.f32.mrf.mxu0 }
 0x103   : > { %v362_v8 = vpop.f32.mrf.mxu0 }
 0x104   : > { %v1899_v9 = vpack.c.bf16 %v362_v8, %v359_v6 }
 0x105   : > { %v1349_v10 = vpop.f32.mrf.mxu0 }
 0x106   : > { %498 = vrot.lane.b32.xlu1 %v1899_v9, %s1727_s16  ;;  %375 = vrot.lane.b32.xlu0 %v1899_v9, %s1728_s17 }
 0x10a   : > { %623 = vrot.lane.b32.xlu1 %v1899_v9, %s1729_s24  ;;  %500 = vrot.lane.b32.xlu0 %v1899_v9, %s1730_s25  ;;  %s1741_s24 = smov [#allocation9]  }
 0x10b   : > { %s1639_s25 = sshll.u32 %s1741_s24, 4  ;;  %s1640_s25 = int_to_ptr.vmem [resolvable:$false] %s1639_s25 }
 0x10e   : > { %746 = vrot.lane.b32.xlu1 %v1899_v9, %s1731_s27  ;;  %621 = vrot.lane.b32.xlu0 %v1899_v9, %s1732_s29  ;;  %s1641_s27 = scalar_lea.vmem %s1640_s25, 512 }
 0x112   : > { %744 = vrot.lane.b32.xlu0 %v1899_v9, %s1733_s9 }
 0x178   : > { %v376_v11 = vpop.permute.xlu0 %375  ;;  %v499_v14 = vpop.permute.xlu1 %498 }
 0x179   : > { %v382_v12 = vsel %vm377_vm2, %v376_v11, 0 }
 0x17a   : > { %1351 = vmatpush3.bf16.xpose.msra.mxu1 %v382_v12 }
 0x17b   : > { %1362 = vmatprep.subr.bf16.mxu1 %v1725_v0 }
 0x17c   : > { %v501_v13 = vpop.permute.xlu0 %500  ;;  %v624_v16 = vpop.permute.xlu1 %623 }
 0x17d   : > { %v506_v15 = vsel %vm377_vm2, %v501_v13, 0  ;;  %v629_v17 = vsel %vm377_vm2, %v624_v16, 0 }
 0x180   : > { %v747_v18 = vpop.permute.xlu1 %746  ;;  %v622_v19 = vpop.permute.xlu0 %621 }
 0x181   : > { %1353 = vmatmul.mubr.msk.bf16.vlgmr.msra.gmra.mxu1 %vm377_vm2, %v1899_v9  ;;  %v752_v20 = vsel %vm377_vm2, %v747_v18, 0 }
 0x182   : > { %1363 = vmatpush3.bf16.xpose.msra.mxu1 %v506_v15  ;;  %1364 = vmatprep.mubr.msk.bf16.mxu1 %vm1726_vm0, %v1725_v0 }
 0x183   : > { %1374 = vmatprep.subr.bf16.mxu1 %v1725_v0 }
 0x184   : > { %v745_v21 = vpop.permute.xlu0 %744 }
 0x189   : > { %1365 = vmatmul.mubr.msk.bf16.vlgmr.msra.gmra.mxu1 %vm377_vm2, %v499_v14 }
 0x18a   : > { %1375 = vmatpush3.bf16.xpose.msra.mxu1 %v629_v17  ;;  %1376 = vmatprep.mubr.msk.bf16.mxu1 %vm1726_vm0, %v1725_v0 }
 0x18b   : > { %1386 = vmatprep.subr.bf16.mxu1 %v1725_v0 }
 0x191   : > { %1377 = vmatmul.mubr.msk.bf16.vlgmr.msra.gmra.mxu1 %vm377_vm2, %v622_v19 }
 0x192   : > { %1387 = vmatpush3.bf16.xpose.msra.mxu1 %v752_v20  ;;  %1388 = vmatprep.mubr.msk.bf16.mxu1 %vm1726_vm0, %v1725_v0 }
 0x193   : > { %1398 = vmatprep.subr.bf16.mxu1 %v1725_v0 }
 0x199   : > { %1389 = vmatmul.mubr.msk.bf16.vlgmr.msra.gmra.mxu1 %vm377_vm2, %v745_v21 }
 0x19a   : > { %1402 = vmatprep.mubr.msk.bf16.mxu1 %vm1726_vm0, %v1725_v0 }
 0x241   : > { %v418_v26 = vpop.f32.mrf.mxu1 }
 0x242   : > { %v425_v27 = vsel %vm372_vm3, -inf, %v418_v26 }
 0x243   : > { %v1354_v28 = vpop.f32.mrf.mxu1  ;;  %v428_v29 = vsel %vm427_vm4, %v425_v27, -inf }
 0x244   : > { %429 = vmax.xlane.f32.xlu1 %v428_v29 }
 0x245   : > { %v421_v30 = vpop.f32.mrf.mxu1 }
 0x246   : > { %v426_v31 = vsel %vm373_vm5, -inf, %v421_v30 }
 0x247   : > { %v1355_v32 = vpop.f32.mrf.mxu1  ;;  %v431_v33 = vsel %vm427_vm4, %v426_v31, -inf }
 0x248   : > { %432 = vmax.xlane.f32.xlu0 %v431_v33 }
 0x249   : > { %v542_v34 = vpop.f32.mrf.mxu1 }
 0x24a   : > { %v549_v35 = vsel %vm372_vm3, -inf, %v542_v34 }
 0x24b   : > { %v1366_v36 = vpop.f32.mrf.mxu1  ;;  %v551_v37 = vsel %vm427_vm4, %v549_v35, -inf }
 0x24c   : > { %552 = vmax.xlane.f32.xlu0 %v551_v37 }
 0x24d   : > { %v545_v38 = vpop.f32.mrf.mxu1 }
 0x24e   : > { %v550_v39 = vsel %vm373_vm5, -inf, %v545_v38 }
 0x24f   : > { %v1367_v40 = vpop.f32.mrf.mxu1  ;;  %v554_v41 = vsel %vm427_vm4, %v550_v39, -inf }
 0x250   : > { %555 = vmax.xlane.f32.xlu1 %v554_v41 }
 0x251   : > { %v665_v42 = vpop.f32.mrf.mxu1 }
 0x252   : > { %v672_v43 = vsel %vm372_vm3, -inf, %v665_v42 }
 0x253   : > { %v1378_v44 = vpop.f32.mrf.mxu1  ;;  %v674_v45 = vsel %vm427_vm4, %v672_v43, -inf }
 0x254   : > { %675 = vmax.xlane.f32.xlu0 %v674_v45 }
 0x255   : > { %v668_v46 = vpop.f32.mrf.mxu1 }
 0x256   : > { %v673_v47 = vsel %vm373_vm5, -inf, %v668_v46 }
 0x257   : > { %v1379_v48 = vpop.f32.mrf.mxu1  ;;  %v677_v49 = vsel %vm427_vm4, %v673_v47, -inf }
 0x258   : > { %678 = vmax.xlane.f32.xlu1 %v677_v49 }
 0x259   : > { %v788_v50 = vpop.f32.mrf.mxu1 }
 0x25a   : > { %v795_v51 = vsel %vm372_vm3, -inf, %v788_v50 }
 0x25b   : > { %v1390_v52 = vpop.f32.mrf.mxu1  ;;  %v797_v53 = vsel %vm427_vm4, %v795_v51, -inf }
 0x25c   : > { %798 = vmax.xlane.f32.xlu0 %v797_v53 }
 0x25d   : > { %v791_v54 = vpop.f32.mrf.mxu1 }
 0x25e   : > { %v796_v55 = vsel %vm373_vm5, -inf, %v791_v54 }
 0x25f   : > { %v1391_v56 = vpop.f32.mrf.mxu1  ;;  %v800_v57 = vsel %vm427_vm4, %v796_v55, -inf }
 0x260   : > { %801 = vmax.xlane.f32.xlu1 %v800_v57 }
 0x2cd   : > { %v430_v58 = vpop.xlane.xlu1 %429 }
 0x2ce   : > { %v434_v59 = vsub.f32 %v425_v27, %v430_v58 }
 0x2d0   : > { %v436_v60 = vmul.f32 1.442695, %v434_v59 }
 0x2d1   : > { %v433_v61 = vpop.xlane.xlu0 %432 }
 0x2d2   : > { %1547 = vpow2.f32 %v436_v60  ;;  %v435_v62 = vsub.f32 %v426_v31, %v433_v61 }
 0x2d4   : > { %v438_v63 = vmul.f32 1.442695, %v435_v62 }
 0x2d5   : > { %v553_v1 = vpop.xlane.xlu0 %552 }
 0x2d6   : > { %1549 = vpow2.f32 %v438_v63  ;;  %v557_v2 = vsub.f32 %v549_v35, %v553_v1 }
 0x2d8   : > { %v559_v5 = vmul.f32 1.442695, %v557_v2 }
 0x2d9   : > { %v556_v13 = vpop.xlane.xlu1 %555 }
 0x2da   : > { %1551 = vpow2.f32 %v559_v5  ;;  %v558_v14 = vsub.f32 %v550_v39, %v556_v13 }
 0x2dc   : > { %v561_v18 = vmul.f32 1.442695, %v558_v14 }
 0x2dd   : > { %v676_v15 = vpop.xlane.xlu0 %675 }
 0x2de   : > { %v680_v17 = vsub.f32 %v672_v43, %v676_v15  ;;  %1553 = vpow2.f32 %v561_v18 }
 0x2df   : > { %v1548_v6 = vpop.eup %1547 }
 0x2e0   : > { %v440_v7 = vsel %vm427_vm4, %v1548_v6, 0.0  ;;  %v682_v22 = vmul.f32 1.442695, %v680_v17 }
 0x2e1   : > { %441 = vadd.xlane.f32.xlu0 %v440_v7  ;;  %v679_v16 = vpop.xlane.xlu1 %678 }
 0x2e2   : > { %v681_v19 = vsub.f32 %v673_v47, %v679_v16  ;;  %1555 = vpow2.f32 %v682_v22  ;;  %v1538_v16 = vld [vmem:[#allocation4 + $0x8] sm:$0xff]  }
 0x2e3   : > { %v1550_v8 = vpop.eup %1549  ;;  %1399 = vmatpush3.bf16.msra.mxu1 %v1538_v16 }
 0x2e4   : > { %v443_v10 = vsel %vm427_vm4, %v1550_v8, 0.0  ;;  %v684_v24 = vmul.f32 1.442695, %v681_v19  ;;  %1400 = vmatprep.subr.bf16.mxu1 %v1725_v0 }
 0x2e5   : > { %444 = vadd.xlane.f32.xlu1 %v443_v10  ;;  %v799_v20 = vpop.xlane.xlu0 %798 }
 0x2e6   : > { %v803_v23 = vsub.f32 %v795_v51, %v799_v20  ;;  %1557 = vpow2.f32 %v684_v24 }
 0x2e7   : > { %v1947_v11 = vpop.eup %1551 }
 0x2e8   : > { %v563_v12 = vsel %vm427_vm4, %v1947_v11, 0.0  ;;  %v805_v26 = vmul.f32 1.442695, %v803_v23 }
 0x2e9   : > { %564 = vadd.xlane.f32.xlu0 %v563_v12  ;;  %v802_v21 = vpop.xlane.xlu1 %801 }
 0x2ea   : > { %v804_v25 = vsub.f32 %v796_v55, %v802_v21  ;;  %1559 = vpow2.f32 %v805_v26  ;;  %v1539_v21 = vld [vmem:[#allocation4] sm:$0xff]  }
 0x2eb   : > { %v1554_v28 = vpop.eup %1553  ;;  %1401 = vmatpush3.bf16.msra.mxu1 %v1539_v21 }
 0x2ec   : > { %v807_v27 = vmul.f32 1.442695, %v804_v25  ;;  %v566_v30 = vsel %vm427_vm4, %v1554_v28, 0.0  ;;  %1414 = vmatprep.subr.bf16.mxu1 %v1725_v0 }
 0x2ee   : > { %1561 = vpow2.f32 %v807_v27 }
 0x2ef   : > { %v1556_v29 = vpop.eup %1555 }
 0x2f0   : > { %v686_v34 = vsel %vm427_vm4, %v1556_v29, 0.0 }
 0x2f3   : > { %v1558_v31 = vpop.eup %1557 }
 0x2f4   : > { %v689_v33 = vsel %vm427_vm4, %v1558_v31, 0.0 }
 0x2f6   : > { %574 = vrot.lane.b32.xlu1 %v1899_v9, %s1734_s7  ;;  %s281_s7 = sand.u32 1, %s1703_s19  }
 0x2f7   : > { %v1954_v32 = vpop.eup %1559  ;;  %s2025_s17 = scalar_lea.sflag [#allocation6], %s281_s7 }
 0x2f8   : > { %v809_v37 = vsel %vm427_vm4, %v1954_v32, 0.0 }
 0x2fb   : > { %v1562_v35 = vpop.eup %1561 }
 0x2fc   : > { %v812_v36 = vsel %vm427_vm4, %v1562_v35, 0.0 }
 0x2ff   : > { %451 = vrot.lane.b32.xlu0 %v1899_v9, %s1735_s10  ;;  %s1276_s10 = sshll.u32 %s281_s7, 4 }
 0x31a   : > { %567 = vadd.xlane.f32.xlu1 %v566_v30 }
 0x31e   : > { %690 = vadd.xlane.f32.xlu1 %v689_v33  ;;  %687 = vadd.xlane.f32.xlu0 %v686_v34 }
 0x322   : > { %813 = vadd.xlane.f32.xlu1 %v812_v36  ;;  %810 = vadd.xlane.f32.xlu0 %v809_v37 }
 0x333   : > { %697 = vrot.lane.b32.xlu1 %v1899_v9, %s1736_s8  ;;  %s1311_s8 = sshll.u32 %s1711_s21, 8 }
 0x334   : > { %s2020_s16 = scalar_lea.hbm %s2076_s5, %s1311_s8 }
 0x338   : > { %820 = vrot.lane.b32.xlu0 %v1899_v9, %s1737_s11  ;;  %s283_s11 = scalar_lea.vmem [#allocation9], %s1276_s10 }
 0x36a   : > { %v442_v38 = vpop.xlane.xlu0 %441 }
 0x36b   : > { %1563 = vrcp.f32 %v442_v38 }
 0x36e   : > { %v445_v39 = vpop.xlane.xlu1 %444 }
 0x36f   : > { %1565 = vrcp.f32 %v445_v39 }
 0x372   : > { %v565_v40 = vpop.xlane.xlu0 %564  ;;  %v575_v47 = vpop.permute.xlu1 %574 }
 0x373   : > { %1567 = vrcp.f32 %v565_v40 }
 0x376   : > { %v452_v41 = vpop.permute.xlu0 %451 }
 0x377   : > { %1357 = vmatpush3.bf16.msra.mxu0 %v452_v41 }
 0x378   : > { %1368 = vmatprep.subr.bf16.mxu0 %v1725_v0  ;;  %v1564_v42 = vpop.eup %1563 }
 0x379   : > { %v448_v44 = vmul.f32 %v1564_v42, %v1548_v6 }
 0x37c   : > { %v1566_v43 = vpop.eup %1565 }
 0x37d   : > { %v449_v45 = vmul.f32 %v1566_v43, %v1550_v8 }
 0x37f   : > { %v450_v46 = vpack.c.bf16 %v449_v45, %v448_v44 }
 0x380   : > { %v1568_v52 = vpop.eup %1567 }
 0x381   : > { %1359 = vmatmul.mubr.msk.bf16.vlgmr.msra.gmra.mxu0 %vm427_vm4, %v450_v46  ;;  %v571_v54 = vmul.f32 %v1568_v52, %v1947_v11  ;;  %v1540_v46 = vld [vmem:[#allocation7 + $0x8] sm:$0xff]  }
 0x382   : > { %1369 = vmatpush3.bf16.msra.mxu0 %v575_v47  ;;  %1370 = vmatprep.mubr.msk.bf16.mxu0 %vm1726_vm0, %v1725_v0  ;;  %v1541_v47 = vld [vmem:[#allocation7] sm:$0xff]  }
 0x383   : > { %1380 = vmatprep.subr.bf16.mxu0 %v1725_v0 }
 0x3a3   : > { %v568_v9 = vpop.xlane.xlu1 %567 }
 0x3a4   : > { %1569 = vrcp.f32 %v568_v9 }
 0x3a7   : > { %v691_v48 = vpop.xlane.xlu1 %690  ;;  %v688_v49 = vpop.xlane.xlu0 %687 }
 0x3a8   : > { %1571 = vrcp.f32 %v691_v48 }
 0x3a9   : > { %1573 = vrcp.f32 %v688_v49 }
 0x3ab   : > { %v814_v50 = vpop.xlane.xlu1 %813  ;;  %v811_v51 = vpop.xlane.xlu0 %810 }
 0x3ac   : > { %1575 = vrcp.f32 %v814_v50 }
 0x3ad   : > { %1577 = vrcp.f32 %v811_v51 }
 0x3af   : > { %v698_v59 = vpop.permute.xlu1 %697  ;;  %v821_v2 = vpop.permute.xlu0 %820 }
 0x3b1   : > { %v1570_v53 = vpop.eup %1569 }
 0x3b2   : > { %v572_v55 = vmul.f32 %v1570_v53, %v1554_v28 }
 0x3b4   : > { %v573_v56 = vpack.c.bf16 %v572_v55, %v571_v54 }
 0x3b5   : > { %v1572_v57 = vpop.eup %1571 }
 0x3b6   : > { %v1574_v58 = vpop.eup %1573  ;;  %1371 = vmatmul.mubr.msk.bf16.vlgmr.msra.gmra.mxu0 %vm427_vm4, %v573_v56  ;;  %v695_v61 = vmul.f32 %v1572_v57, %v1558_v31  ;;  %v1544_v56 = vld [vmem:[%s2075_s4 + $0x10] sm:$0xff]   ;;  %v1546_v57 = vld [vmem:[%s2075_s4] sm:$0xff]  }
 0x3b7   : > { %1381 = vmatpush3.bf16.msra.mxu0 %v698_v59  ;;  %1382 = vmatprep.mubr.msk.bf16.mxu0 %vm1726_vm0, %v1725_v0  ;;  %v694_v60 = vmul.f32 %v1574_v58, %v1556_v29 }
 0x3b8   : > { %1392 = vmatprep.subr.bf16.mxu0 %v1725_v0 }
 0x3b9   : > { %v1576_v62 = vpop.eup %1575  ;;  %v696_v63 = vpack.c.bf16 %v695_v61, %v694_v60 }
 0x3ba   : > { %v1578_v1 = vpop.eup %1577  ;;  %v818_v6 = vmul.f32 %v1576_v62, %v1562_v35 }
 0x3bb   : > { %v817_v5 = vmul.f32 %v1578_v1, %v1954_v32 }
 0x3bd   : > { %v819_v7 = vpack.c.bf16 %v818_v6, %v817_v5 }
 0x3be   : > { %1383 = vmatmul.mubr.msk.bf16.vlgmr.msra.gmra.mxu0 %vm427_vm4, %v696_v63 }
 0x3bf   : > { %1393 = vmatpush3.bf16.msra.mxu0 %v821_v2  ;;  %1394 = vmatprep.mubr.msk.bf16.mxu0 %vm1726_vm0, %v1725_v0 }
 0x3c0   : > { %1406 = vmatprep.subr.bf16.mxu0 %v1725_v0 }
 0x3c6   : > { %1395 = vmatmul.mubr.msk.bf16.vlgmr.msra.gmra.mxu0 %vm427_vm4, %v819_v7 }
 0x3c7   : > { %1410 = vmatprep.mubr.msk.bf16.mxu0 %vm1726_vm0, %v1725_v0  ;;  %1407 = vmatpush3.bf16.msra.mxu0 %v1540_v46 }
 0x3c8   : > { %1408 = vmatprep.subr.bf16.mxu0 %v1725_v0 }
 0x3cb   : > { %1409 = vmatpush3.bf16.msra.mxu0 %v1541_v47 }
 0x441   : > { %v491_v8 = vpop.f32.mrf.mxu0 }
 0x443   : > { %v1360_v10 = vpop.f32.mrf.mxu0 }
 0x445   : > { %v494_v11 = vpop.f32.mrf.mxu0 }
 0x447   : > { %v1361_v12 = vpop.f32.mrf.mxu0 }
 0x476   : > { %v614_v13 = vpop.f32.mrf.mxu0 }
 0x478   : > { %v1372_v14 = vpop.f32.mrf.mxu0 }
 0x47a   : > { %v617_v15 = vpop.f32.mrf.mxu0 }
 0x47b   : > { %v1521_v17 = vpack.i.bf16 %v617_v15, %v614_v13 }
 0x47c   : > { %v1373_v18 = vpop.f32.mrf.mxu0 }
 0x47d   : > { %1522 = vrot.lane.b32.xlu1 %v1521_v17, %s1738_s12 }
 0x47e   : > { %v737_v19 = vpop.f32.mrf.mxu0 }
 0x480   : > { %v1384_v20 = vpop.f32.mrf.mxu0 }
 0x482   : > { %v740_v22 = vpop.f32.mrf.mxu0 }
 0x483   : > { %v1526_v23 = vpack.i.bf16 %v740_v22, %v737_v19 }
 0x484   : > { %v1385_v24 = vpop.f32.mrf.mxu0 }
 0x485   : > { %1527 = vrot.lane.b32.xlu0 %v1526_v23, %s1739_s13  ;;  %s1157_s13 = sshll.u32 %s283_s11, 4  ;;  %s2022_s13 = int_to_ptr.vmem [resolvable:$true] %s1157_s13 }
 0x486   : > { %v860_v25 = vpop.f32.mrf.mxu0  ;;  %s1635_s21 = scalar_lea.vmem %s2022_s13, 256  ;;  %p1642_p0 = scmp.lt.s32.totalorder %s2022_s13, %s1640_s25 }
 0x487   : > { %p1636_p8 = scmp.ne.s32.totalorder %s2022_s13, %s1635_s21  ;;  %p1643_p6 = scmp.lt.s32.totalorder %s1641_s27, %s1635_s21 }
 0x488   : > { %v1396_v26 = vpop.f32.mrf.mxu0 }
 0x489   : > { %p1637_p11 = pnand %p1636_p8, %p2083_p10  ;;  %p1644_p7 = por %p1643_p6, %p1642_p0 }
 0x48a   : > { %v863_v27 = vpop.f32.mrf.mxu0 }
 0x48b   : > { %v1531_v28 = vpack.i.bf16 %v863_v27, %v860_v25  ;;  %p1638_p13 = pneg %p1637_p11 }
 0x48c   : > { %v1397_v29 = vpop.f32.mrf.mxu0 }
 0x48d   : > { %1532 = vrot.lane.b32.xlu1 %v1531_v28, %s1740_s14  ;;  %p1645_p9 = pnand %p1644_p7, %p1638_p13 }
 0x4ef   : > { %v1523_v30 = vpop.permute.xlu1 %1522 }
 0x4f0   : > { %v1525_v32 = vunpack.i.h.bf16 %v1523_v30  ;;  %v1524_v33 = vunpack.i.l.bf16 %v1523_v30 }
 0x4f2   : > { %v892_v37 = vsel %vm377_vm2, %v494_v11, %v1525_v32  ;;  %v891_v38 = vsel %vm377_vm2, %v491_v8, %v1524_v33 }
 0x4f7   : > { %v1528_v31 = vpop.permute.xlu0 %1527 }
 0x4f8   : > { %v1530_v34 = vunpack.i.h.bf16 %v1528_v31  ;;  %v1529_v35 = vunpack.i.l.bf16 %v1528_v31 }
 0x4fa   : > { %v894_v41 = vsel %vm427_vm4, %v892_v37, %v1530_v34  ;;  %v893_v42 = vsel %vm427_vm4, %v891_v38, %v1529_v35 }
 0x4ff   : > { %v1533_v36 = vpop.permute.xlu1 %1532 }
 0x500   : > { %v1535_v39 = vunpack.i.h.bf16 %v1533_v36  ;;  %v1534_v40 = vunpack.i.l.bf16 %v1533_v36 }
 0x502   : > { %v897_v43 = vsel %vm895_vm6, %v894_v41, %v1535_v39  ;;  %v896_v44 = vsel %vm895_vm6, %v893_v42, %v1534_v40 }
 0x503   : > { %v898_v45 = vpack.c.bf16 %v897_v43, %v896_v44 }
 0x505   : > { %1403 = vmatmul.mubr.msk.bf16.vlgmr.msra.gmra.mxu1 %vm321_vm1, %v898_v45 }
 0x506   : > { %1422 = vmatprep.mubr.msk.bf16.mxu1 %vm1726_vm0, %v1725_v0 }
 0x5c5   : > { %v952_v9 = vpop.f32.mrf.mxu1 }
 0x5c6   : > { %v959_v48 = vadd.f32 %v952_v9, %v1888_v3  ;;  %v1543_v3 = vld [vmem:[%s2075_s4 + $0x18] sm:$0xff]  }
 0x5c7   : > { %v1404_v49 = vpop.f32.mrf.mxu1  ;;  %1415 = vmatpush3.bf16.msra.mxu1 %v1543_v3 }
 0x5c8   : > { %v1309_v50 = vpack.c.bf16 %v959_v48, %v959_v48  ;;  %972 = vst.msk [vmem:[#allocation3] sm:$0xff] %vm321_vm1, %v959_v48  ;;  %1416 = vmatprep.subr.bf16.mxu1 %v1725_v0 }
 0x5c9   : > { %v955_v51 = vpop.f32.mrf.mxu1 }
 0x5ca   : > { %970 = vst.msk [vmem:[#allocation2] sm:$0xf] %vm969_vm7, %v1309_v50  ;;  %v960_v52 = vadd.f32 %v955_v51, %v1890_v4  ;;  %v1545_v4 = vld [vmem:[%s2075_s4 + $0x8] sm:$0xff]  }
 0x5cb   : > { %v1405_v53 = vpop.f32.mrf.mxu1  ;;  %1417 = vmatpush3.bf16.msra.mxu1 %v1544_v56 }
 0x5cc   : > { %v1310_v54 = vpack.c.bf16 %v960_v52, %v960_v52  ;;  %973 = vst.msk [vmem:[#allocation3 + $0x8] sm:$0xff] %vm321_vm1, %v960_v52  ;;  %1418 = vmatprep.subr.bf16.mxu1 %v1725_v0 }
 0x5ce   : > { %971 = vst.msk [vmem:[#allocation2 + $0x4] sm:$0xf] %vm969_vm7, %v1310_v54 }
 0x5cf   : > { %1419 = vmatpush3.bf16.msra.mxu1 %v1545_v4  ;;  %v1053_v12 = vld [vmem:[#allocation3] sm:$0xff] }
 0x5d0   : > { %1420 = vmatprep.subr.bf16.mxu1 %v1725_v0 }
 0x5d3   : > { %1421 = vmatpush3.bf16.msra.mxu1 %v1546_v57  ;;  %v1054_v16 = vld [vmem:[#allocation3 + $0x8] sm:$0xff] }
 0x5d5   : > { %v1542_v55 = vld [vmem:[#allocation2] sm:$0xff]  }
 0x5d6   : > { %1411 = vmatmul.mubr.msk.bf16.vlgmr.msra.gmra.mxu0 %vm321_vm1, %v1542_v55 }
 0x696   : > { %v1035_v58 = vpop.f32.mrf.mxu0 }
 0x697   : > { %v1042_v59 = vmul.f32 0.70710677, %v1035_v58 }
 0x698   : > { %v1412_v60 = vpop.f32.mrf.mxu0 }
 0x699   : > { %1579 = verf.f32 %v1042_v59 }
 0x69a   : > { %v1038_v61 = vpop.f32.mrf.mxu0 }
 0x69b   : > { %v1043_v62 = vmul.f32 0.70710677, %v1038_v61 }
 0x69c   : > { %v1413_v63 = vpop.f32.mrf.mxu0 }
 0x69d   : > { %1581 = verf.f32 %v1043_v62 }
 0x6a6   : > { %v1580_v1 = vpop.eup %1579 }
 0x6a7   : > { %v1046_v2 = vadd.f32 1.0, %v1580_v1 }
 0x6a9   : > { %v1048_v6 = vmul.f32 0.5, %v1046_v2 }
 0x6aa   : > { %v1582_v5 = vpop.eup %1581 }
 0x6ab   : > { %v1047_v7 = vadd.f32 1.0, %v1582_v5  ;;  %v1050_v8 = vmul.f32 %v1048_v6, %v1035_v58 }
 0x6ad   : > { %v1049_v0 = vmul.f32 0.5, %v1047_v7 }
 0x6af   : > { %v1051_v10 = vmul.f32 %v1049_v0, %v1038_v61 }
 0x6b1   : > { %v1052_v11 = vpack.c.bf16 %v1051_v10, %v1050_v8 }
 0x6b3   : > { %1423 = vmatmul.mubr.msk.bf16.vlgmr.msra.gmra.mxu1 %vm1087_vm8, %v1052_v11 }
 0x773   : > { %v1125_v13 = vpop.f32.mrf.mxu1 }
 0x774   : > { %v1132_v14 = vadd.f32 %v1125_v13, %v1053_v12 }
 0x775   : > { %v1424_v15 = vpop.f32.mrf.mxu1 }
 0x776   : > { %1134 = vst.msk [vmem:[#allocation3] sm:$0xff] %vm321_vm1, %v1132_v14 }
 0x777   : > { %v1128_v17 = vpop.f32.mrf.mxu1 }
 0x778   : > { %v1133_v18 = vadd.f32 %v1128_v17, %v1054_v16 }
 0x779   : > { %v1425_v19 = vpop.f32.mrf.mxu1 }
 0x77a   : > { %1135 = vst.msk [vmem:[#allocation3 + $0x8] sm:$0xff] %vm321_vm1, %v1133_v18 }
 0x77d   : > { %v1139_v20 = vld [vmem:[#allocation3] sm:$0xff] }
 0x77e   : > { %1141 = vst.msk [vmem:[%s283_s11] sm:$0xff] %vm321_vm1, %v1139_v20 }
 0x781   : > { %v1140_v21 = vld [vmem:[#allocation3 + $0x8] sm:$0xff] }
 0x782   : > { %1142 = vst.msk [vmem:[%s283_s11 + $0x8] sm:$0xff] %vm321_vm1, %v1140_v21 }
 0x783   : > { %1648 = shalt.err (!%p1645_p9)
}
 0x784   : > { %s1649_s29 = scalar_lea.hbm %s2020_s16, 256  ;;  %s1653_s10 = scalar_lea.hbm %s2076_s5, 512 }
 0x785   : > { %p1650_p12 = scmp.ne.s32.totalorder %s2020_s16, %s1649_s29  ;;  %p1654_p5 = scmp.lt.s32.totalorder %s2020_s16, %s2076_s5 }
 0x786   : > { %p1655_p3 = scmp.lt.s32.totalorder %s1653_s10, %s1649_s29 }
 0x787   : > { %p1651_p1 = pnand %p1650_p12, %p2083_p10 }
 0x788   : > { %p1656_p4 = por %p1655_p3, %p1654_p5 }
 0x789   : > { %p1652_p2 = pneg %p1651_p1 }
 0x78b   : > { %p1657_p8 = pnand %p1656_p4, %p1652_p2 }
 0x78d   : > { %1660 = shalt.err (!%p1657_p8)
}
 0x78e   : > { %s1742_s14 = smov 128  }
 0x78f   : > { %1434 = dma.vmem_to_hbm [thread:$0]  (%p2083_p10), %s2022_s13, 256, %s2020_s16, %s2025_s17, %s1742_s14, %s1742_s14, %s1738_s12  }
 0x790 PF: > { %p1451_p11 = scmp.ge.s32.totalorder %s1719_s23, 2  ;;  %s1172_s15 = sand.u32 1, %s1699_s18  }
 0x791   : > { %p2084_p13 = scmp.ne.s32.totalorder %s2079_s30, 0  ;;  %s1173_s21 = scalar_lea.sflag [#allocation6], %s1172_s15 }
 0x793   : > { %p1444_p0 = pnand %p1451_p11, %p2084_p13 }
 0x795   : > { %p1445_p6 = pneg %p1444_p0 }
 0x797   : > { %1694 = dma.done.wait (%p1445_p6), %s1173_s21, 256  }
 0x798   : > { %1696 = vsyncadd (%p1445_p6), %s1173_s21, 4294967040  ;;  %s20_s23 = sadd.s32 1, %s1719_s23   ;;  %s2085_s18 = smov %s1703_s19 }
 0x799   : > { %p17_p7 = scmp.ge.s32.totalorder %s20_s23, 4   ;;  %s2086_s19 = smov %s1707_s20 }
 0x79a   : > { %s2087_s20 = smov %s1826_s6  ;;  %s2088_s21 = smov %s1715_s22 }
 0x79b   : > { %s2089_s22 = smov %s2091_s26  ;;  %19 = sbr.rel (!%p17_p7) target bundleno = 6 (0x6), region = 96 }
 0x7a0   :  { %1178 = vsyncpa [#allocation5], 1 }
 0x7a1   :  { %1180 = vsyncpa [#allocation5 + $0x1], 1 }
 0x7a2   :  { %1181 = vsyncpa [#allocation8], 1 }
 0x7a3   :  { %1182 = vsyncpa [#allocation6], 1 }
 0x7a4   :  { %1184 = vsyncpa [#allocation6 + $0x1], 1 }

</bundles_post_ra>
